<compile_context>
chip_gen: v7x
topology: tpu7x:2x2x1
jax: 0.10.0
libtpu: 0.0.40
codegen_flags: <defaults>
</compile_context>

<pallas_src>
import functools

import jax
import jax.numpy as jnp
from jax.experimental import pallas as pl
from jax.experimental.pallas import tpu as pltpu


def _round_up(x, m):
    return (x + m - 1) // m * m


def _qconv_kernel(msg_ref, ht_ref, w1_ref, w2h_ref, w2n_ref, b2_ref, out_ref):
    # msg_ref: [D, in_feat+3, TILE_N] bf16   gathered messages, nodes on lanes
    # ht_ref : [in_feat, TILE_N]      bf16   node features, nodes on lanes
    # w1_ref : [inter, in_feat+3]     bf16   linear1.weight (fused node+edge halves)
    # w2h_ref: [out_pad, in_feat]     bf16   linear2.weight[:, :in_feat] (row-padded)
    # w2n_ref: [out_pad, inter]       bf16   linear2.weight[:, in_feat:] (row-padded)
    # b2_ref : [out_pad, 1]           f32    linear2.bias (row-padded with zeros)
    # out_ref: [out_pad, TILE_N]      f32    transposed output, nodes on lanes
    degree = msg_ref.shape[0]
    inter = w1_ref.shape[0]
    tile_n = msg_ref.shape[-1]

    w1 = w1_ref[...]
    # linear1 + leaky_relu per neighbor, accumulated into one lane-dense [inter, TILE_N]
    # tile (live state stays ~inter*tile_n f32 — no spills).
    acc = jnp.zeros((inter, tile_n), dtype=jnp.float32)
    for d in range(degree):  # degree is a small static constant
        t = jnp.dot(w1, msg_ref[d], preferred_element_type=jnp.float32)
        acc = acc + jnp.where(t >= 0.0, t, 0.01 * t)   # leaky_relu, slope 0.01
    h_n = acc * (1.0 / degree)                         # mean over neighbors

    # linear2 on cat([h, h_N]) expressed as split matmuls (transposed), + bias, relu
    out = (jnp.dot(w2h_ref[...], ht_ref[...], preferred_element_type=jnp.float32)
           + jnp.dot(w2n_ref[...], h_n.astype(w2n_ref.dtype),
                     preferred_element_type=jnp.float32)
           + b2_ref[...])
    out_ref[...] = jnp.maximum(out, 0.0).astype(out_ref.dtype)


def qconv_forward(h, nbr_idx, w_edge, w1, w2, b2, *, tile_n=512):
    """QConv forward.

    h:       [N, in_feat] f32 node features
    nbr_idx: [N, D] int32 — source node of each of node n's D incoming edges
    w_edge:  [N, D, 3] f32 edge features
    w1:      [inter, in_feat+3]        (linear1.weight, no bias)
    w2:      [out_feat, in_feat+inter] (linear2.weight)
    b2:      [out_feat]                (linear2.bias)
    """
    n_nodes, in_feat = h.shape
    degree = nbr_idx.shape[1]
    edge_feat = w_edge.shape[-1]
    feat = in_feat + edge_feat
    inter_dim = w1.shape[0]
    out_feat = w2.shape[0]

    # ---- kernel-friendly parameter layouts (fused W1, row-padded W2, bf16) ----
    out_pad = _round_up(out_feat, 8)                    # f32 sublane pad only (not 128)
    pad_r = out_pad - out_feat
    w1_b = w1.astype(jnp.bfloat16)                                           # [inter, feat]
    w2h = jnp.pad(w2[:, :in_feat], ((0, pad_r), (0, 0))).astype(jnp.bfloat16)   # [out_pad, in_feat]
    w2n = jnp.pad(w2[:, in_feat:], ((0, pad_r), (0, 0))).astype(jnp.bfloat16)   # [out_pad, inter]
    b2_p = jnp.pad(b2, (0, pad_r)).reshape(out_pad, 1).astype(jnp.float32)      # [out_pad, 1]

    # ---- node tiling: nodes go on lanes, so tile_n must be a multiple of 128 ----
    tile_n = _round_up(max(int(tile_n), 128), 128)
    if n_nodes > 128:
        # cap so the grid has >=2 steps (v7x megacore + DMA/compute overlap)
        tile_n = min(tile_n, _round_up(-(-n_nodes // 2), 128))
    n_pad = _round_up(n_nodes, tile_n)
    pad_n = n_pad - n_nodes
    grid = (n_pad // tile_n,)

    # ---- node-on-lanes bf16 activations (gather / concat / transpose in XLA) ----
    h_bf = h.astype(jnp.bfloat16)
    h_nbr = jnp.take(h_bf, nbr_idx, axis=0)                                  # [N, D, in_feat]
    msgs = jnp.concatenate([h_nbr, w_edge.astype(jnp.bfloat16)], axis=-1)    # [N, D, feat]
    msgs_t = jnp.transpose(msgs, (1, 2, 0))                                  # [D, feat, N]
    ht = h_bf.T                                                              # [in_feat, N]
    if pad_n:
        msgs_t = jnp.pad(msgs_t, ((0, 0), (0, 0), (0, pad_n)))
        ht = jnp.pad(ht, ((0, 0), (0, pad_n)))

    flops = (2 * degree * n_pad * feat * inter_dim
             + 2 * n_pad * (in_feat + inter_dim) * out_pad)
    bytes_accessed = (2 * (msgs_t.size + ht.size)
                      + 2 * (w1_b.size + w2h.size + w2n.size)
                      + 4 * b2_p.size + 4 * out_pad * n_pad)

    out_t = pl.pallas_call(
        _qconv_kernel,
        out_shape=jax.ShapeDtypeStruct((out_pad, n_pad), jnp.float32),
        grid=grid,
        in_specs=[
            pl.BlockSpec((degree, feat, tile_n), lambda i: (0, 0, i)),   # messages
            pl.BlockSpec((in_feat, tile_n), lambda i: (0, i)),           # h (transposed)
            pl.BlockSpec((inter_dim, feat), lambda i: (0, 0)),           # W1 (resident)
            pl.BlockSpec((out_pad, in_feat), lambda i: (0, 0)),          # W2_h (resident)
            pl.BlockSpec((out_pad, inter_dim), lambda i: (0, 0)),        # W2_n (resident)
            pl.BlockSpec((out_pad, 1), lambda i: (0, 0)),                # b2  (resident)
        ],
        out_specs=pl.BlockSpec((out_pad, tile_n), lambda i: (0, i)),
        compiler_params=pltpu.CompilerParams(
            dimension_semantics=("parallel",),
            # post layout-fix the per-step footprint is ~hundreds of KB; 48 MiB is
            # safe headroom on v7x (64 MiB VMEM) and generous on v5e/v6e (128 MiB).
            vmem_limit_bytes=48 * 1024 * 1024),
        cost_estimate=pl.CostEstimate(
            flops=flops, transcendentals=0, bytes_accessed=bytes_accessed),
    )(msgs_t, ht, w1_b, w2h, w2n, b2_p)

    # slice off padded feature rows / node columns, back to [N, out_feat]
    return out_t[:out_feat, :n_nodes].T


def qconv_reference(h, nbr_idx, w_edge, w1, w2, b2):
    """Pure-JAX reference mirroring the kernel's bf16 operand quantization."""
    hb = h.astype(jnp.bfloat16).astype(jnp.float32)
    wb = w_edge.astype(jnp.bfloat16).astype(jnp.float32)
    w1f = w1.astype(jnp.bfloat16).astype(jnp.float32)
    w2f = w2.astype(jnp.bfloat16).astype(jnp.float32)
    h_nbr = jnp.take(hb, nbr_idx, axis=0)                      # [N, D, in_feat]
    msgs = jnp.concatenate([h_nbr, wb], axis=-1)               # [N, D, in_feat+3]
    tmp = jnp.einsum('ndf,if->ndi', msgs, w1f)                 # linear1 (no bias)
    tmp = jnp.where(tmp >= 0.0, tmp, 0.01 * tmp)               # leaky_relu
    h_n = jnp.mean(tmp, axis=1)
    h_n = h_n.astype(jnp.bfloat16).astype(jnp.float32)         # mirror kernel cast
    h_total = jnp.concatenate([hb, h_n], axis=1)
    out = h_total @ w2f.T + b2.reshape(1, -1)
    return jnp.maximum(out, 0.0)


def xavier_normal(key, shape, gain):
    # shape = (fan_out, fan_in) as in torch nn.Linear.weight
    fan_out, fan_in = shape
    std = gain * (2.0 / (fan_in + fan_out)) ** 0.5
    return std * jax.random.normal(key, shape, dtype=jnp.float32)


if __name__ == "__main__":
    # Small synthetic problem consistent with the module's forward.
    N, D = 300, 4              # nodes, fixed in-degree per node (multi-step grid)
    in_feat, inter_dim, out_feat = 8, 16, 4

    key = jax.random.PRNGKey(0)
    k_h, k_w, k_idx, k_w1, k_w2, k_b2 = jax.random.split(key, 6)

    # Inputs: node features, neighbor indices, edge features (dim 3, per the "+3")
    h = jax.random.normal(k_h, (N, in_feat), dtype=jnp.float32)
    w_edge = jax.random.normal(k_w, (N, D, 3), dtype=jnp.float32)
    nbr_idx = jax.random.randint(k_idx, (N, D), 0, N, dtype=jnp.int32)

    # Parameters (xavier_normal with relu gain = sqrt(2)), linear2 bias uniform
    gain = 2.0 ** 0.5
    w1 = xavier_normal(k_w1, (inter_dim, in_feat + 3), gain)           # linear1.weight
    w2 = xavier_normal(k_w2, (out_feat, in_feat + inter_dim), gain)    # linear2.weight
    bound = 1.0 / ((in_feat + inter_dim) ** 0.5)
    b2 = jax.random.uniform(k_b2, (out_feat,), jnp.float32, -bound, bound)  # linear2.bias

    # tile_n=128 -> n_pad=384, grid=(3,): exercises a multi-step pipelined grid.
    fwd = jax.jit(functools.partial(qconv_forward, tile_n=128))
    out = fwd(h, nbr_idx, w_edge, w1, w2, b2)
    out = jax.block_until_ready(out)

    ref = qconv_reference(h, nbr_idx, w_edge, w1, w2, b2)
    assert out.shape == (N, out_feat)
    assert jnp.allclose(out, ref, atol=1e-2, rtol=1e-2), float(jnp.max(jnp.abs(out - ref)))

    print("KERNEL_OK")
</pallas_src>

<mosaic_0001>
module attributes {stable_mosaic.version = 11 : i64} {
  func.func @_qconv_kernel(%arg0: i32, %arg1: memref<4x11x128xbf16, #tpu.memory_space<vmem>>, %arg2: memref<8x128xbf16, #tpu.memory_space<vmem>>, %arg3: memref<16x11xbf16, #tpu.memory_space<vmem>>, %arg4: memref<8x8xbf16, #tpu.memory_space<vmem>>, %arg5: memref<8x16xbf16, #tpu.memory_space<vmem>>, %arg6: memref<8x1xf32, #tpu.memory_space<vmem>>, %arg7: memref<8x128xf32, #tpu.memory_space<vmem>>) attributes {dimension_semantics = [#tpu.dimension_semantics<parallel>], iteration_bounds = array<i64: 3>, scalar_prefetch = 0 : i64, scratch_operands = 0 : i64, tpu.core_type = #tpu.core_type<tc>, window_params = [{transform_indices = @transform_0, window_bounds = array<i64: 4, 11, 128>}, {transform_indices = @transform_1, window_bounds = array<i64: 8, 128>}, {pipeline_mode = #tpu.pipeline_mode<synchronous>, transform_indices = @transform_2, window_bounds = array<i64: 16, 11>}, {pipeline_mode = #tpu.pipeline_mode<synchronous>, transform_indices = @transform_3, window_bounds = array<i64: 8, 8>}, {pipeline_mode = #tpu.pipeline_mode<synchronous>, transform_indices = @transform_4, window_bounds = array<i64: 8, 16>}, {pipeline_mode = #tpu.pipeline_mode<synchronous>, transform_indices = @transform_5, window_bounds = array<i64: 8, 1>}, {transform_indices = @transform_6, window_bounds = array<i64: 8, 128>}]} {
    %c0 = arith.constant 0 : index
    %c0_0 = arith.constant 0 : index
    %0 = vector.load %arg3[%c0, %c0_0] : memref<16x11xbf16, #tpu.memory_space<vmem>>, vector<16x11xbf16>
    %cst = arith.constant 0.000000e+00 : f32
    %1 = vector.broadcast %cst : f32 to vector<16x128xf32>
    %c0_1 = arith.constant 0 : index
    %c0_2 = arith.constant 0 : index
    %c0_3 = arith.constant 0 : index
    %2 = vector.load %arg1[%c0_1, %c0_2, %c0_3] : memref<4x11x128xbf16, #tpu.memory_space<vmem>>, vector<1x11x128xbf16>
    %3 = vector.shape_cast %2 : vector<1x11x128xbf16> to vector<11x128xbf16>
    %cst_4 = arith.constant dense<0.000000e+00> : vector<16x128xf32>
    %4 = tpu.matmul %0, %3, %cst_4 {dimension_numbers = #tpu.dot_dimension_numbers<[1], [0], [0], [1], [0, 0, 1, 1], [], []>} : vector<16x11xbf16>, vector<11x128xbf16>, vector<16x128xf32> -> vector<16x128xf32>
    %cst_5 = arith.constant 0.000000e+00 : f32
    %5 = vector.broadcast %cst_5 : f32 to vector<16x128xf32>
    %6 = arith.cmpf oge, %4, %5 : vector<16x128xf32>
    %cst_6 = arith.constant 0.00999999977 : f32
    %7 = vector.broadcast %cst_6 : f32 to vector<16x128xf32>
    %8 = arith.mulf %7, %4 : vector<16x128xf32>
    %9 = arith.select %6, %4, %8 : vector<16x128xi1>, vector<16x128xf32>
    %10 = arith.addf %1, %9 : vector<16x128xf32>
    %c1 = arith.constant 1 : index
    %c0_7 = arith.constant 0 : index
    %c0_8 = arith.constant 0 : index
    %11 = vector.load %arg1[%c1, %c0_7, %c0_8] : memref<4x11x128xbf16, #tpu.memory_space<vmem>>, vector<1x11x128xbf16>
    %12 = vector.shape_cast %11 : vector<1x11x128xbf16> to vector<11x128xbf16>
    %cst_9 = arith.constant dense<0.000000e+00> : vector<16x128xf32>
    %13 = tpu.matmul %0, %12, %cst_9 {dimension_numbers = #tpu.dot_dimension_numbers<[1], [0], [0], [1], [0, 0, 1, 1], [], []>} : vector<16x11xbf16>, vector<11x128xbf16>, vector<16x128xf32> -> vector<16x128xf32>
    %cst_10 = arith.constant 0.000000e+00 : f32
    %14 = vector.broadcast %cst_10 : f32 to vector<16x128xf32>
    %15 = arith.cmpf oge, %13, %14 : vector<16x128xf32>
    %cst_11 = arith.constant 0.00999999977 : f32
    %16 = vector.broadcast %cst_11 : f32 to vector<16x128xf32>
    %17 = arith.mulf %16, %13 : vector<16x128xf32>
    %18 = arith.select %15, %13, %17 : vector<16x128xi1>, vector<16x128xf32>
    %19 = arith.addf %10, %18 : vector<16x128xf32>
    %c2 = arith.constant 2 : index
    %c0_12 = arith.constant 0 : index
    %c0_13 = arith.constant 0 : index
    %20 = vector.load %arg1[%c2, %c0_12, %c0_13] : memref<4x11x128xbf16, #tpu.memory_space<vmem>>, vector<1x11x128xbf16>
    %21 = vector.shape_cast %20 : vector<1x11x128xbf16> to vector<11x128xbf16>
    %cst_14 = arith.constant dense<0.000000e+00> : vector<16x128xf32>
    %22 = tpu.matmul %0, %21, %cst_14 {dimension_numbers = #tpu.dot_dimension_numbers<[1], [0], [0], [1], [0, 0, 1, 1], [], []>} : vector<16x11xbf16>, vector<11x128xbf16>, vector<16x128xf32> -> vector<16x128xf32>
    %cst_15 = arith.constant 0.000000e+00 : f32
    %23 = vector.broadcast %cst_15 : f32 to vector<16x128xf32>
    %24 = arith.cmpf oge, %22, %23 : vector<16x128xf32>
    %cst_16 = arith.constant 0.00999999977 : f32
    %25 = vector.broadcast %cst_16 : f32 to vector<16x128xf32>
    %26 = arith.mulf %25, %22 : vector<16x128xf32>
    %27 = arith.select %24, %22, %26 : vector<16x128xi1>, vector<16x128xf32>
    %28 = arith.addf %19, %27 : vector<16x128xf32>
    %c3 = arith.constant 3 : index
    %c0_17 = arith.constant 0 : index
    %c0_18 = arith.constant 0 : index
    %29 = vector.load %arg1[%c3, %c0_17, %c0_18] : memref<4x11x128xbf16, #tpu.memory_space<vmem>>, vector<1x11x128xbf16>
    %30 = vector.shape_cast %29 : vector<1x11x128xbf16> to vector<11x128xbf16>
    %cst_19 = arith.constant dense<0.000000e+00> : vector<16x128xf32>
    %31 = tpu.matmul %0, %30, %cst_19 {dimension_numbers = #tpu.dot_dimension_numbers<[1], [0], [0], [1], [0, 0, 1, 1], [], []>} : vector<16x11xbf16>, vector<11x128xbf16>, vector<16x128xf32> -> vector<16x128xf32>
    %cst_20 = arith.constant 0.000000e+00 : f32
    %32 = vector.broadcast %cst_20 : f32 to vector<16x128xf32>
    %33 = arith.cmpf oge, %31, %32 : vector<16x128xf32>
    %cst_21 = arith.constant 0.00999999977 : f32
    %34 = vector.broadcast %cst_21 : f32 to vector<16x128xf32>
    %35 = arith.mulf %34, %31 : vector<16x128xf32>
    %36 = arith.select %33, %31, %35 : vector<16x128xi1>, vector<16x128xf32>
    %37 = arith.addf %28, %36 : vector<16x128xf32>
    %cst_22 = arith.constant 2.500000e-01 : f32
    %38 = vector.broadcast %cst_22 : f32 to vector<16x128xf32>
    %39 = arith.mulf %37, %38 : vector<16x128xf32>
    %c0_23 = arith.constant 0 : index
    %c0_24 = arith.constant 0 : index
    %40 = vector.load %arg4[%c0_23, %c0_24] : memref<8x8xbf16, #tpu.memory_space<vmem>>, vector<8x8xbf16>
    %c0_25 = arith.constant 0 : index
    %c0_26 = arith.constant 0 : index
    %41 = vector.load %arg2[%c0_25, %c0_26] : memref<8x128xbf16, #tpu.memory_space<vmem>>, vector<8x128xbf16>
    %cst_27 = arith.constant dense<0.000000e+00> : vector<8x128xf32>
    %42 = tpu.matmul %40, %41, %cst_27 {dimension_numbers = #tpu.dot_dimension_numbers<[1], [0], [0], [1], [0, 0, 1, 1], [], []>} : vector<8x8xbf16>, vector<8x128xbf16>, vector<8x128xf32> -> vector<8x128xf32>
    %c0_28 = arith.constant 0 : index
    %c0_29 = arith.constant 0 : index
    %43 = vector.load %arg5[%c0_28, %c0_29] : memref<8x16xbf16, #tpu.memory_space<vmem>>, vector<8x16xbf16>
    %44 = arith.truncf %39 : vector<16x128xf32> to vector<16x128xbf16>
    %cst_30 = arith.constant dense<0.000000e+00> : vector<8x128xf32>
    %45 = tpu.matmul %43, %44, %cst_30 {dimension_numbers = #tpu.dot_dimension_numbers<[1], [0], [0], [1], [0, 0, 1, 1], [], []>} : vector<8x16xbf16>, vector<16x128xbf16>, vector<8x128xf32> -> vector<8x128xf32>
    %46 = arith.addf %42, %45 : vector<8x128xf32>
    %c0_31 = arith.constant 0 : index
    %c0_32 = arith.constant 0 : index
    %47 = vector.load %arg6[%c0_31, %c0_32] : memref<8x1xf32, #tpu.memory_space<vmem>>, vector<8x1xf32>
    %48 = vector.broadcast %47 : vector<8x1xf32> to vector<8x128xf32>
    %49 = arith.addf %46, %48 : vector<8x128xf32>
    %cst_33 = arith.constant 0.000000e+00 : f32
    %50 = vector.broadcast %cst_33 : f32 to vector<8x128xf32>
    %51 = arith.maximumf %49, %50 : vector<8x128xf32>
    %c0_34 = arith.constant 0 : index
    %c0_35 = arith.constant 0 : index
    %52 = vector.load %arg7[%c0_34, %c0_35] : memref<8x128xf32, #tpu.memory_space<vmem>>, vector<8x128xf32>
    tpu.vector_store %arg7[%c0_34, %c0_35], %51 {strides = array<i32>} : memref<8x128xf32, #tpu.memory_space<vmem>>, vector<8x128xf32>,
    return
  }
  func.func @transform_0(%arg0: i32) -> (i32, i32, i32) {
    %c0_i32 = arith.constant 0 : i32
    %c0_i32_0 = arith.constant 0 : i32
    %c0_i32_1 = arith.constant 0 : i32
    return %c0_i32, %c0_i32_0, %arg0 : i32, i32, i32
  }
  func.func @transform_1(%arg0: i32) -> (i32, i32) {
    %c0_i32 = arith.constant 0 : i32
    %c0_i32_0 = arith.constant 0 : i32
    return %c0_i32, %arg0 : i32, i32
  }
  func.func @transform_2(%arg0: i32) -> (i32, i32) {
    %c0_i32 = arith.constant 0 : i32
    %c0_i32_0 = arith.constant 0 : i32
    %c0_i32_1 = arith.constant 0 : i32
    return %c0_i32, %c0_i32_0 : i32, i32
  }
  func.func @transform_3(%arg0: i32) -> (i32, i32) {
    %c0_i32 = arith.constant 0 : i32
    %c0_i32_0 = arith.constant 0 : i32
    %c0_i32_1 = arith.constant 0 : i32
    return %c0_i32, %c0_i32_0 : i32, i32
  }
  func.func @transform_4(%arg0: i32) -> (i32, i32) {
    %c0_i32 = arith.constant 0 : i32
    %c0_i32_0 = arith.constant 0 : i32
    %c0_i32_1 = arith.constant 0 : i32
    return %c0_i32, %c0_i32_0 : i32, i32
  }
  func.func @transform_5(%arg0: i32) -> (i32, i32) {
    %c0_i32 = arith.constant 0 : i32
    %c0_i32_0 = arith.constant 0 : i32
    %c0_i32_1 = arith.constant 0 : i32
    return %c0_i32, %c0_i32_0 : i32, i32
  }
  func.func @transform_6(%arg0: i32) -> (i32, i32) {
    %c0_i32 = arith.constant 0 : i32
    %c0_i32_0 = arith.constant 0 : i32
    return %c0_i32, %arg0 : i32, i32
  }
}

</mosaic_0001>

<bundles_post_ra>
// kernel: qconv_forward.1
= control target key start
LH: loop header
LB: loop body
LE: loop exit
PB: predicated region body
PF: predicated region fallthrough
CT: control target
= control target key end

     0   :  { %s943_s21 = smov 0   ;;  %s945_s22 = smov 0   ;;  %s1022_s0 = inlined_call_operand.vmem [shape: bf16[4,11,384], index: 0, kind: input, shape index: {}]   ;;  %s1023_s1 = inlined_call_operand.vmem [shape: bf16[8,384], index: 1, kind: input, shape index: {}]   ;;  %s1024_s2 = inlined_call_operand.vmem [shape: bf16[16,11], index: 2, kind: input, shape index: {}]   ;;  %s1025_s3 = inlined_call_operand.vmem [shape: bf16[8,8], index: 3, kind: input, shape index: {}]   ;;  %s1026_s4 = inlined_call_operand.vmem [shape: bf16[8,16], index: 4, kind: input, shape index: {}]   ;;  %s1027_s5 = inlined_call_operand.vmem [shape: f32[8,1], index: 5, kind: input, shape index: {}]   ;;  %s1028_s6 = inlined_call_operand.vmem [shape: f32[8,384], index: 6, kind: output, shape index: {}]  }
   0x1   :  { %s947_s23 = smov 0  }
   0x2 LB: > { %s769_s24 = sadd.s32 4294967295, %s902_s23   ;;  %s960_s25 = sadd.s32 1, %s902_s23   ;;  %s902_s23 = sphi %s947_s23, %s1031_s23   ;;  %s898_s22 = sphi %s945_s22, %s1030_s22   ;;  %s894_s21 = sphi %s943_s21, %s1029_s21  }
   0x3   : > { %s20_s26 = ssub.s32 %s902_s23, %s960_s25  ;;  %s23_s27 = sadd.s32 1, %s898_s22 }
   0x4   : > { %p21_p0 = scmp.eq.s32.totalorder %s20_s26, 0  ;;  %p30_p1 = scmp.ne.s32.totalorder %s898_s22, %s894_s21 }
   0x5   : > { %p31_p2 = scmp.eq.s32.totalorder %s902_s23, 0  ;;  %p772_p4 = scmp.ge.s32.totalorder %s902_s23, 3 }
   0x6   : > { %s969_s28 = scalar_select %p21_p0, %s898_s22, %s23_s27  }
   0x7   : > { %p32_p3 = por %p31_p2, %p30_p1  ;;  %204 = sbr.rel (%p772_p4) target bundleno = 23 (0x17), region = 32 }
   0xe   : > { %207 = sbr.rel (!%p32_p3) target bundleno = 23 (0x17), region = 36  ;;  %s209_s29 = sand.u32 (%p32_p3), 1, %s898_s22  }
   0xf   : > { %s774_s30 = sshll.u32 (%p32_p3), %s902_s23, 2  ;;  %s773_s7 = sshll.u32 (%p32_p3), %s209_s29, 5 }
  0x10   : > { %s213_s10 = scalar_lea.vmem (%p32_p3), %s1022_s0, %s774_s30  ;;  %s211_s11 = scalar_lea.vmem (%p32_p3), [#allocation2], %s773_s7 }
  0x11   : > { %v229_v0 = vld [vmem:[%s213_s10] sm:$0xf] (%p32_p3)  ;;  %v231_v1 = vld [vmem:[%s213_s10 + $0xc] sm:$0xf] (%p32_p3)  ;;  %v233_v2 = vld [vmem:[%s213_s10 + $0x18] sm:$0xf] (%p32_p3) }
  0x12   : > { %230 = vst [vmem:[%s211_s11] sm:$0xf] (%p32_p3), %v229_v0  ;;  %232 = vst [vmem:[%s211_s11 + $0x4] sm:$0xf] (%p32_p3), %v231_v1  ;;  %v235_v3 = vld [vmem:[%s213_s10 + $0x24] sm:$0xf] (%p32_p3) }
  0x13   : > { %v237_v4 = vld [vmem:[%s213_s10 + $0x30] sm:$0xf] (%p32_p3)  ;;  %234 = vst [vmem:[%s211_s11 + $0x8] sm:$0xf] (%p32_p3), %v233_v2  ;;  %236 = vst [vmem:[%s211_s11 + $0xc] sm:$0xf] (%p32_p3), %v235_v3 }
  0x14   : > { %238 = vst [vmem:[%s211_s11 + $0x10] sm:$0xf] (%p32_p3), %v237_v4  ;;  %v239_v5 = vld [vmem:[%s213_s10 + $0x3c] sm:$0xf] (%p32_p3)  ;;  %v241_v6 = vld [vmem:[%s213_s10 + $0x48] sm:$0xf] (%p32_p3) }
  0x15   : > { %v243_v7 = vld [vmem:[%s213_s10 + $0x54] sm:$0xf]  ;;  %240 = vst [vmem:[%s211_s11 + $0x14] sm:$0xf] %v239_v5  ;;  %242 = vst [vmem:[%s211_s11 + $0x18] sm:$0xf] %v241_v6 }
  0x16   : > { %244 = vst [vmem:[%s211_s11 + $0x1c] sm:$0xf] %v243_v7 }
  0x17 PF: > { %p775_p5 = scmp.ge.s32.totalorder %s902_s23, 1  ;;  %p289_p6 = scmp.lt.s32.totalorder %s902_s23, 4 }
  0x19   : > { %p290_p7 = pnand %p775_p5, %p289_p6 }
  0x1a   : > { %s296_s12 = sand.u32 (!%p290_p7), 1, %s894_s21   ;;  %vm355_vm0 = vcmask (!%p290_p7), 1044480   ;;  %vm356_vm1 = vcmask (!%p290_p7), 1045504   ;;  %v904_v8 = vmov (!%p290_p7), 0.0   ;;  %v905_v9 = vmov (!%p290_p7), 65535   ;;  %v877_v14 = vld [vmem:[%s1024_s2] sm:$0xff] (!%p290_p7)  }
  0x1b   : > { %293 = sbr.rel (%p290_p7) target bundleno = 490 (0x1ea), region = 81  ;;  %810 = vmatprep.subr.bf16.mxu0 (!%p290_p7), %v904_v8  ;;  %816 = vmatprep.subr.bf16.mxu1 (!%p290_p7), %v904_v8  ;;  %s776_s13 = sshll.u32 (!%p290_p7), %s296_s12, 5  ;;  %v357_v10 = vsel (!%p290_p7), %vm355_vm0, 4294967295, %v905_v9  ;;  %vm906_vm2 = vmmov (!%p290_p7), 0   ;;  %vm351_vm3 = vcmask (!%p290_p7), 89088   ;;  %vm645_vm4 = vcmask (!%p290_p7), 1043456  }
  0x1c   : > { %v358_v11 = vsel (!%p290_p7), %vm356_vm1, %v357_v10, 0  ;;  %812 = vmatprep.mubr.msk.bf16.mxu0 (!%p290_p7), %vm906_vm2, %v904_v8  ;;  %818 = vmatprep.mubr.msk.bf16.mxu1 (!%p290_p7), %vm906_vm2, %v904_v8  ;;  %s298_s14 = scalar_lea.vmem (!%p290_p7), [#allocation2], %s776_s13  ;;  %p328_p8 = scmp.lt.s32.totalorder (!%p290_p7), %s769_s24, 2  ;;  %v593_v23 = vld [vmem:[%s1025_s3] sm:$0xf] (!%p290_p7)  ;;  %vm641_vm5 = vcmask (!%p290_p7), 64512  }
  0x1d   : > { %v875_v12 = vld [vmem:[%s298_s14] sm:$0x3f] (!%p290_p7)   ;;  %v876_v13 = vld [vmem:[%s298_s14 + $0x8] sm:$0x3f] (!%p290_p7)   ;;  %v878_v16 = vld [vmem:[%s298_s14 + $0x10] sm:$0x3f] (!%p290_p7)  }
  0x1e   : > { %v360_v15 = vand.u32 (!%p290_p7), %v875_v12, %v358_v11  ;;  %v420_v17 = vand.u32 (!%p290_p7), %v876_v13, %v358_v11  ;;  %v879_v18 = vld [vmem:[%s298_s14 + $0x18] sm:$0x3f] (!%p290_p7)   ;;  %v480_v19 = vand.u32 (!%p290_p7), %v878_v16, %v358_v11  ;;  %v689_v24 = vld [vmem:[%s1027_s5] sm:$0xff] (!%p290_p7)  ;;  %v907_v25 = vmov (!%p290_p7), 0  }
  0x1f   : > { %v540_v20 = vand.u32 (!%p290_p7), %v879_v18, %v358_v11  ;;  %874 = vset.pattern.permute.xlu0 (!%p290_p7), %v907_v25  ;;  %v595_v3 = vld [vmem:[%s1026_s4] sm:$0xf] (!%p290_p7)  ;;  %vm597_vm14 = vcmask (!%p290_p7), 130048  }
  0x20   : > { %811 = vmatpush3.bf16.msra.mxu0 (!%p290_p7), %v360_v15  ;;  %817 = vmatpush3.bf16.msra.mxu1 (!%p290_p7), %v420_v17 }
  0x21   : > { %822 = vmatprep.subr.bf16.mxu0 (!%p290_p7), %v904_v8  ;;  %828 = vmatprep.subr.bf16.mxu1 (!%p290_p7), %v904_v8 }
  0x22   : > { %s1033_s24 = smov (!%p328_p8, %s769_s24), 2  ;;  %692 = vperm.xlu0 %874, %v689_v24  }
  0x23   : > { %813 = vmatmul.mubr.msk.bf16.vlgmr.msra.gmra.mrb[0].mxu0 %vm351_vm3, %v877_v14  ;;  %819 = vmatmul.mubr.msk.bf16.vlgmr.msra.gmra.mrb[0].mxu1 %vm351_vm3, %v877_v14  ;;  %s777_s17 = sshll.u32 %s1033_s24, 2  ;;  %s778_s7 = sshll.u32 %s1033_s24, 3 }
  0x24   : > { %823 = vmatpush3.bf16.msra.mxu0 %v480_v19  ;;  %829 = vmatpush3.bf16.msra.mxu1 %v540_v20  ;;  %s331_s20 = scalar_lea.vmem %s1023_s1, %s777_s17  ;;  %s335_s10 = scalar_lea.vmem %s1028_s6, %s778_s7 }
  0x25   : > { %824 = vmatprep.mubr.msk.bf16.mxu0 %vm906_vm2, %v904_v8  ;;  %830 = vmatprep.mubr.msk.bf16.mxu1 %vm906_vm2, %v904_v8  ;;  %v594_v21 = vld [vmem:[%s331_s20] sm:$0xf] }
  0x26   : > { %834 = vmatprep.subr.bf16.mxu0 %v904_v8  ;;  %840 = vmatprep.subr.bf16.mxu1 %v904_v8  ;;  %v647_v22 = vsel %vm645_vm4, %v594_v21, 0 }
  0x2b   : > { %825 = vmatmul.mubr.msk.bf16.vlgmr.msra.gmra.mrb[4].mxu0 %vm351_vm3, %v877_v14  ;;  %831 = vmatmul.mubr.msk.bf16.vlgmr.msra.gmra.mrb[4].mxu1 %vm351_vm3, %v877_v14 }
  0x2c   : > { %836 = vmatprep.mubr.msk.bf16.mxu0 %vm906_vm2, %v904_v8  ;;  %842 = vmatprep.mubr.msk.bf16.mxu1 %vm906_vm2, %v904_v8 }
  0x2d   : > { %841 = vmatpush3.bf16.msra.mxu1 %v647_v22 }
  0x33   : > { %843 = vmatmul.mubr.msk.bf16.vlgmr.msra.gmra.mrb[8].mxu1 %vm641_vm5, %v593_v23 }
  0xa1   : > { %v693_v9 = vpop.permute.xlu0 %692 }
  0xf6   : > { %v396_v26 = vpop.f32.mrb[0].mxu0  ;;  %v456_v28 = vpop.f32.mrb[0].mxu1 }
  0xf7   : > { %vm403_vm6 = vcmp.ge.f32.partialorder %v396_v26, 0.0  ;;  %v405_v27 = vmul.f32 0.01, %v396_v26  ;;  %v814_v29 = vpop.f32.mrb[1].mxu0  ;;  %vm463_vm7 = vcmp.ge.f32.partialorder %v456_v28, 0.0  ;;  %v820_v31 = vpop.f32.mrb[1].mxu1 }
  0xf8   : > { %v465_v30 = vmul.f32 0.01, %v456_v28  ;;  %v399_v32 = vpop.f32.mrb[2].mxu0  ;;  %v459_v35 = vpop.f32.mrb[2].mxu1 }
  0xf9   : > { %v407_v33 = vsel %vm403_vm6, %v396_v26, %v405_v27  ;;  %vm404_vm8 = vcmp.ge.f32.partialorder %v399_v32, 0.0  ;;  %v406_v34 = vmul.f32 0.01, %v399_v32  ;;  %v815_v36 = vpop.f32.mrb[3].mxu0  ;;  %vm464_vm9 = vcmp.ge.f32.partialorder %v459_v35, 0.0  ;;  %v821_v39 = vpop.f32.mrb[3].mxu1 }
  0xfa   : > { %v467_v37 = vsel %vm463_vm7, %v456_v28, %v465_v30  ;;  %v466_v38 = vmul.f32 0.01, %v459_v35 }
  0xfb   : > { %v469_v40 = vadd.f32 %v467_v37, %v407_v33  ;;  %v408_v41 = vsel %vm404_vm8, %v399_v32, %v406_v34 }
  0xfc   : > { %v468_v42 = vsel %vm464_vm9, %v459_v35, %v466_v38 }
  0xfd   : > { %v470_v43 = vadd.f32 %v468_v42, %v408_v41 }
  0xfe   : > { %v516_v44 = vpop.f32.mrb[4].mxu0  ;;  %v576_v46 = vpop.f32.mrb[4].mxu1 }
  0xff   : > { %vm523_vm10 = vcmp.ge.f32.partialorder %v516_v44, 0.0  ;;  %v525_v45 = vmul.f32 0.01, %v516_v44  ;;  %v826_v47 = vpop.f32.mrb[5].mxu0  ;;  %vm583_vm11 = vcmp.ge.f32.partialorder %v576_v46, 0.0  ;;  %v832_v49 = vpop.f32.mrb[5].mxu1 }
 0x100   : > { %v585_v48 = vmul.f32 0.01, %v576_v46  ;;  %v519_v50 = vpop.f32.mrb[6].mxu0  ;;  %v579_v53 = vpop.f32.mrb[6].mxu1 }
 0x101   : > { %v527_v51 = vsel %vm523_vm10, %v516_v44, %v525_v45  ;;  %vm524_vm12 = vcmp.ge.f32.partialorder %v519_v50, 0.0  ;;  %v526_v52 = vmul.f32 0.01, %v519_v50  ;;  %v827_v54 = vpop.f32.mrb[7].mxu0  ;;  %vm584_vm13 = vcmp.ge.f32.partialorder %v579_v53, 0.0  ;;  %v833_v57 = vpop.f32.mrb[7].mxu1 }
 0x102   : > { %v529_v55 = vadd.f32 %v527_v51, %v469_v40  ;;  %v586_v56 = vmul.f32 0.01, %v579_v53  ;;  %v587_v58 = vsel %vm583_vm11, %v576_v46, %v585_v48 }
 0x103   : > { %v528_v59 = vsel %vm524_vm12, %v519_v50, %v526_v52 }
 0x104   : > { %v589_v60 = vadd.f32 %v587_v58, %v529_v55  ;;  %v530_v61 = vadd.f32 %v528_v59, %v470_v43  ;;  %v588_v62 = vsel %vm584_vm13, %v579_v53, %v586_v56 }
 0x106   : > { %v590_v63 = vadd.f32 %v588_v62, %v530_v61  ;;  %v591_v0 = vmul.f32 0.25, %v589_v60  ;;  %v683_v4 = vpop.f32.mrb[8].mxu1 }
 0x107   : > { %v844_v5 = vpop.f32.mrb[9].mxu1 }
 0x108   : > { %v592_v1 = vmul.f32 0.25, %v590_v63  ;;  %v686_v6 = vpop.f32.mrb[10].mxu1 }
 0x109   : > { %v845_v7 = vpop.f32.mrb[11].mxu1 }
 0x10a   : > { %v596_v2 = vpack.c.bf16 %v592_v1, %v591_v0 }
 0x10c   : > { %835 = vmatpush3.bf16.msra.mxu0 %v596_v2 }
 0x10f   : > { %837 = vmatmul.mubr.msk.bf16.vlgmr.msra.gmra.mrb[8].mxu0 %vm597_vm14, %v595_v3 }
 0x1e2   : > { %v635_v8 = vpop.f32.mrb[8].mxu0 }
 0x1e3   : > { %v684_v10 = vadd.f32 %v683_v4, %v635_v8  ;;  %v838_v11 = vpop.f32.mrb[9].mxu0 }
 0x1e4   : > { %v638_v12 = vpop.f32.mrb[10].mxu0 }
 0x1e5   : > { %v839_v13 = vpop.f32.mrb[11].mxu0  ;;  %v695_v14 = vadd.f32 %v693_v9, %v684_v10 }
 0x1e7   : > { %v696_v15 = vmax.f32 %v695_v14, 0.0 }
 0x1e9   : > { %697 = vst [vmem:[%s335_s10] sm:$0xff] %v696_v15 }
 0x1ea PF: > { %p13_p9 = scmp.ge.s32.totalorder %s960_s25, 5   ;;  %s1029_s21 = smov %s898_s22 }
 0x1eb   : > { %s1030_s22 = smov %s969_s28  ;;  %s1031_s23 = smov %s960_s25 }
 0x1ec   :  { %15 = sbr.rel (!%p13_p9) target bundleno = 2 (0x2), region = 126 }

</bundles_post_ra>
